<compile_context>
chip_gen: v6e
topology: v6e:2x2x1
jax: 0.10.0
libtpu: 0.0.40
codegen_flags: <defaults>
</compile_context>

<pallas_src>
import functools

import jax
import jax.numpy as jnp
from jax.experimental import pallas as pl
from jax.experimental.pallas import tpu as pltpu


def _round_up(a: int, b: int) -> int:
    return ((a + b - 1) // b) * b


def _device_kind() -> str:
    try:
        return jax.devices()[0].device_kind.lower()
    except Exception:
        return ""


def _tile_vmem_bytes(tl, hb, c_in, c_out, k, in_bytes):
    """Rough per-tile VMEM footprint: double-buffered specs + scratch + temporaries."""
    x_bufs = 2 * c_in * (tl + hb) * in_bytes          # main + halo inputs, 2 buffers
    o_bufs = 2 * c_out * tl * 4                       # pass-2 output, 2 buffers
    w_buf = 2 * k * c_out * c_in * in_bytes           # resident weight
    ext = c_in * (tl + hb) * in_bytes                 # halo-extended scratch
    temps = 2 * c_in * tl * in_bytes + 2 * c_out * tl * 4   # tap window + f32 acc/y
    return x_bufs + o_bufs + w_buf + ext + temps


def _conv_relu(xext_ref, w_ref, b_col, *, k: int, dilation: int, tl: int):
    """Dilated conv + bias + ReLU for one L tile.

    xext_ref: VMEM scratch (C_in_pad, TL + HB) = [ main tile | halo columns ]
    w_ref:    (K, C_out, C_in_pad) tap-major weight
    b_col:    (C_out, 1) f32 bias column
    returns   (C_out, TL) f32
    """
    # K accumulated MXU matmuls over static windows of the contiguous buffer:
    # no lane-misaligned concatenates, no axis-0 tap stack.
    acc = jnp.dot(w_ref[0], xext_ref[:, pl.ds(0, tl)],
                  preferred_element_type=jnp.float32)
    for t in range(1, k):
        s = t * dilation                       # static offset, s <= halo <= HB
        acc = acc + jnp.dot(w_ref[t], xext_ref[:, pl.ds(s, tl)],
                            preferred_element_type=jnp.float32)
    return jnp.maximum(acc + b_col, 0.0)


def _stats_kernel(xm_ref, xh_ref, w_ref, b_ref, stats_ref, xext_ref, *,
                  k, dilation, tl, l_out, num_l):
    """Pass 1: per-batch per-channel sum / sum-of-squares of relu(conv(x)+b)."""
    j = pl.program_id(1)

    @pl.when(j == 0)
    def _():
        stats_ref[...] = jnp.zeros_like(stats_ref)

    # Build the halo-extended buffer with two lane-aligned stores.
    xext_ref[:, :tl] = xm_ref[0]
    xext_ref[:, tl:] = xh_ref[0]
    y = _conv_relu(xext_ref, w_ref, b_ref[...], k=k, dilation=dilation, tl=tl)

    def _accum(yy):
        s1 = jnp.sum(yy, axis=1)[None, :]               # (1, C_out)
        s2 = jnp.sum(yy * yy, axis=1)[None, :]          # (1, C_out)
        stats_ref[...] += jnp.concatenate([s1, s2], axis=0)[None]

    if l_out % tl != 0:
        # Only the last L tile runs past L_out: mask there, skip the
        # iota/compare/select on every other tile.
        @pl.when(j < num_l - 1)
        def _():
            _accum(y)

        @pl.when(j == num_l - 1)
        def _():
            col = j * tl + jax.lax.broadcasted_iota(jnp.int32, y.shape, 1)
            _accum(jnp.where(col < l_out, y, 0.0))
    else:
        _accum(y)


def _normalize_kernel(xm_ref, xh_ref, w_ref, b_ref, scale_ref, shift_ref, o_ref,
                      xext_ref, *, k, dilation, tl):
    """Pass 2: recompute conv+ReLU, apply fused BN affine, lane-dense store."""
    xext_ref[:, :tl] = xm_ref[0]
    xext_ref[:, tl:] = xh_ref[0]
    y = _conv_relu(xext_ref, w_ref, b_ref[...], k=k, dilation=dilation, tl=tl)
    o_ref[0] = (y * scale_ref[...] + shift_ref[...]).astype(o_ref.dtype)


def dilated_conv_block(x, weight, bias, gamma, beta, *, kernel_size: int,
                       dilation: int, eps: float = 1e-5,
                       compute_dtype=None, l_tile=None):
    """x: (N, C_in, L); weight: (C_out, C_in, K); bias/gamma/beta: (C_out,).

    Matches PyTorch Conv1d(padding=dilation*(K-1)//2, dilation=dilation) ->
    ReLU -> BatchNorm1d with training-mode (batch) statistics.
    """
    N, C_in, L = x.shape
    C_out, C_in_w, K = weight.shape
    assert C_in_w == C_in and K == kernel_size

    # ---- per-generation defaults (v7x: 64 MiB VMEM / 2 TCs; v5e: bf16 MXU) ----
    kind = _device_kind()
    is_v7x = "v7" in kind
    is_v5e = ("v5e" in kind) or ("v5 lite" in kind) or ("v5lite" in kind)
    big_vmem_part = (("v5" in kind) or ("v6" in kind)) and not is_v7x
    if compute_dtype is None:
        compute_dtype = jnp.bfloat16 if is_v5e else jnp.float32
    if l_tile is None:
        l_tile = 1024 if big_vmem_part else 512
    if is_v7x:
        vmem_limit = 48 * 1024 * 1024
    elif big_vmem_part:
        vmem_limit = 96 * 1024 * 1024
    else:
        vmem_limit = None                       # unknown part: compiler default

    in_bytes = jnp.dtype(compute_dtype).itemsize
    sublane = {4: 8, 2: 16, 1: 32}[in_bytes]
    C_in_pad = _round_up(C_in, sublane)

    halo = dilation * (K - 1)
    pad = halo // 2
    L_out = L + 2 * pad - halo                  # PyTorch Conv1d, stride 1

    # Lane-dense L tiling.  HB is the halo-block width (multiple of 128) and TL
    # is a multiple of HB so the halo BlockSpec's block index (j+1)*(TL//HB)
    # lands exactly at element offset (j+1)*TL.
    HB = _round_up(max(halo, 1), 128)
    TL = max(HB, _round_up(min(l_tile, _round_up(L_out, 128)), HB))
    budget = vmem_limit if vmem_limit is not None else 32 * 1024 * 1024
    while TL > HB and _tile_vmem_bytes(TL, HB, C_in_pad, C_out, K, in_bytes) > budget // 2:
        TL -= HB
    num_l = pl.cdiv(L_out, TL)
    Lx = num_l * TL + HB                        # + halo block after the last tile

    # One pad pass: conv 'same' left pad, right pad up to the tiled length, and
    # zero-pad C_in to the sublane multiple (keeps MXU / vreg tiles aligned).
    # TODO(synk): fold the pad + dtype cast into the kernels (mask the first /
    # last halo columns in-kernel) to save this extra HBM pass over x.
    x_pad = jnp.pad(x, ((0, 0), (0, C_in_pad - C_in), (pad, Lx - pad - L)))
    x_pad = x_pad.astype(compute_dtype)

    # Tap-major weight: w_k[t, o, c] = weight[o, c, t], zero-padded on C_in.
    w_k = jnp.transpose(weight, (2, 0, 1))
    w_k = jnp.pad(w_k, ((0, 0), (0, 0), (0, C_in_pad - C_in))).astype(compute_dtype)
    b_col = bias.reshape(C_out, 1).astype(jnp.float32)

    x_main_spec = pl.BlockSpec((1, C_in_pad, TL), lambda n, j: (n, 0, j))
    # Halo spec: only HB columns starting at element offset (j+1)*TL.
    x_halo_spec = pl.BlockSpec((1, C_in_pad, HB),
                               lambda n, j: (n, 0, (j + 1) * (TL // HB)))
    w_spec = pl.BlockSpec((K, C_out, C_in_pad), lambda n, j: (0, 0, 0))
    col_spec = pl.BlockSpec((C_out, 1), lambda n, j: (0, 0))
    ext_scratch = pltpu.VMEM((C_in_pad, TL + HB), compute_dtype)

    # ---------- pass 1: per-batch partial BN statistics (megacore-parallel) ----------
    stats_part = pl.pallas_call(
        functools.partial(_stats_kernel, k=K, dilation=dilation, tl=TL,
                          l_out=L_out, num_l=num_l),
        out_shape=jax.ShapeDtypeStruct((N, 2, C_out), jnp.float32),
        grid=(N, num_l),
        in_specs=[x_main_spec, x_halo_spec, w_spec, col_spec],
        out_specs=pl.BlockSpec((1, 2, C_out), lambda n, j: (n, 0, 0)),
        scratch_shapes=[ext_scratch],
        compiler_params=pltpu.CompilerParams(
            dimension_semantics=("parallel", "arbitrary"),
            vmem_limit_bytes=vmem_limit),
    )(x_pad, x_pad, w_k, b_col)

    # TODO(synk): E[y^2]-E[y]^2 in f32 can cancel for very large N*L_out; switch
    # to shifted / Welford-style per-tile accumulation if BN accuracy matters.
    stats = jnp.sum(stats_part, axis=0)          # (2, C_out)
    count = N * L_out
    mean = stats[0] / count
    var = jnp.maximum(stats[1] / count - mean * mean, 0.0)   # biased variance
    inv = jax.lax.rsqrt(var + eps)
    scale = (gamma * inv).reshape(C_out, 1).astype(jnp.float32)
    shift = (beta - mean * gamma * inv).reshape(C_out, 1).astype(jnp.float32)

    # ---------- pass 2: recompute conv+ReLU, fused BN affine, lane-dense store ----------
    # (Recompute variant -> no HBM round trip of y.  A store-and-affine split
    #  would halve the MXU work for large, compute-bound channel counts.)
    out = pl.pallas_call(
        functools.partial(_normalize_kernel, k=K, dilation=dilation, tl=TL),
        out_shape=jax.ShapeDtypeStruct((N, C_out, L_out), jnp.float32),
        grid=(N, num_l),
        in_specs=[x_main_spec, x_halo_spec, w_spec, col_spec, col_spec, col_spec],
        out_specs=pl.BlockSpec((1, C_out, TL), lambda n, j: (n, 0, j)),
        scratch_shapes=[ext_scratch],
        compiler_params=pltpu.CompilerParams(
            dimension_semantics=("parallel", "parallel"),
            vmem_limit_bytes=vmem_limit),
    )(x_pad, x_pad, w_k, b_col, scale, shift)
    return out


def _reference(x, weight, bias, gamma, beta, *, dilation, eps=1e-5):
    """Plain-JAX reference matching PyTorch semantics (training-mode BN)."""
    k = weight.shape[-1]
    pad = dilation * (k - 1) // 2
    y = jax.lax.conv_general_dilated(
        x, weight, window_strides=(1,), padding=[(pad, pad)],
        rhs_dilation=(dilation,),
        dimension_numbers=("NCH", "OIH", "NCH"))
    y = y + bias.reshape(1, -1, 1)
    y = jnp.maximum(y, 0.0)
    mean = jnp.mean(y, axis=(0, 2), keepdims=True)
    var = jnp.mean((y - mean) ** 2, axis=(0, 2), keepdims=True)
    y = (y - mean) * jax.lax.rsqrt(var + eps)
    return y * gamma.reshape(1, -1, 1) + beta.reshape(1, -1, 1)


if __name__ == "__main__":
    key = jax.random.PRNGKey(0)

    def _make(k, n, c_in, c_out, l, ks):
        kx, kw, kb, kg, kbe = jax.random.split(k, 5)
        x = jax.random.normal(kx, (n, c_in, l), dtype=jnp.float32)
        w = jax.random.normal(kw, (c_out, c_in, ks), dtype=jnp.float32) * 0.1
        b = jax.random.normal(kb, (c_out,), dtype=jnp.float32) * 0.1
        g = 1.0 + 0.1 * jax.random.normal(kg, (c_out,), dtype=jnp.float32)
        be = 0.1 * jax.random.normal(kbe, (c_out,), dtype=jnp.float32)
        return x, w, b, g, be

    k1, k2 = jax.random.split(key)

    # --- case 1: small shapes from the module's forward (single-tile path) ---
    N, C_IN, C_OUT, L, K, DIL = 2, 4, 8, 16, 3, 2
    x, w, b, g, be = _make(k1, N, C_IN, C_OUT, L, K)
    ref = _reference(x, w, b, g, be, dilation=DIL)

    out = dilated_conv_block(x, w, b, g, be, kernel_size=K, dilation=DIL,
                             compute_dtype=jnp.float32)
    out = jax.block_until_ready(out)
    assert out.shape == (N, C_OUT, L)
    assert jnp.allclose(out, ref, atol=1e-4, rtol=1e-4)

    # bf16 MXU path (the fast / default path on v5e): loose tolerance vs f32 ref.
    out_bf16 = jax.block_until_ready(
        dilated_conv_block(x, w, b, g, be, kernel_size=K, dilation=DIL,
                           compute_dtype=jnp.bfloat16))
    assert out_bf16.shape == (N, C_OUT, L)
    assert jnp.allclose(out_bf16, ref, atol=1e-1, rtol=1e-1)

    # --- case 2: multi-tile + ragged tail + halo crossing + channel padding ---
    N2, C_IN2, C_OUT2, L2, K2, DIL2 = 2, 5, 7, 300, 3, 3
    x2, w2, b2, g2, be2 = _make(k2, N2, C_IN2, C_OUT2, L2, K2)
    ref2 = _reference(x2, w2, b2, g2, be2, dilation=DIL2)
    out2 = jax.block_until_ready(
        dilated_conv_block(x2, w2, b2, g2, be2, kernel_size=K2, dilation=DIL2,
                           compute_dtype=jnp.float32, l_tile=128))
    assert out2.shape == (N2, C_OUT2, L2)
    assert jnp.allclose(out2, ref2, atol=1e-3, rtol=1e-3)

    print("KERNEL_OK")
</pallas_src>

<mosaic_0001>
module attributes {stable_mosaic.version = 11 : i64} {
  func.func @_stats_kernel(%arg0: i32, %arg1: i32, %arg2: memref<1x8x128xf32, #tpu.memory_space<vmem>>, %arg3: memref<1x8x128xf32, #tpu.memory_space<vmem>>, %arg4: memref<3x8x8xf32, #tpu.memory_space<vmem>>, %arg5: memref<8x1xf32, #tpu.memory_space<vmem>>, %arg6: memref<1x2x8xf32, #tpu.memory_space<vmem>>, %arg7: memref<8x256xf32, #tpu.memory_space<vmem>>) attributes {dimension_semantics = [#tpu.dimension_semantics<parallel>, #tpu.dimension_semantics<arbitrary>], iteration_bounds = array<i64: 2, 1>, scalar_prefetch = 0 : i64, scratch_operands = 1 : i64, tpu.core_type = #tpu.core_type<tc>, window_params = [{transform_indices = @transform_0, window_bounds = array<i64: 1, 8, 128>}, {transform_indices = @transform_1, window_bounds = array<i64: 1, 8, 128>}, {pipeline_mode = #tpu.pipeline_mode<synchronous>, transform_indices = @transform_2, window_bounds = array<i64: 3, 8, 8>}, {pipeline_mode = #tpu.pipeline_mode<synchronous>, transform_indices = @transform_3, window_bounds = array<i64: 8, 1>}, {transform_indices = @transform_4, window_bounds = array<i64: 1, 2, 8>}]} {
    %c0_i32 = arith.constant 0 : i32
    %0 = arith.cmpi eq, %arg1, %c0_i32 : i32
    %1 = arith.extui %0 : i1 to i32
    %c0_i32_0 = arith.constant 0 : i32
    %2 = arith.cmpi ne, %1, %c0_i32_0 : i32
    scf.if %2 {
      %cst_30 = arith.constant 0.000000e+00 : f32
      %34 = vector.broadcast %cst_30 : f32 to vector<1x2x8xf32>
      %c0_31 = arith.constant 0 : index
      %c0_32 = arith.constant 0 : index
      %c0_33 = arith.constant 0 : index
      %35 = vector.load %arg6[%c0_31, %c0_32, %c0_33] : memref<1x2x8xf32, #tpu.memory_space<vmem>>, vector<1x2x8xf32>
      tpu.vector_store %arg6[%c0_31, %c0_32, %c0_33], %34 {strides = array<i32>} : memref<1x2x8xf32, #tpu.memory_space<vmem>>, vector<1x2x8xf32>,
    } else {
    }
    %c0 = arith.constant 0 : index
    %c0_1 = arith.constant 0 : index
    %c0_2 = arith.constant 0 : index
    %3 = vector.load %arg2[%c0, %c0_1, %c0_2] : memref<1x8x128xf32, #tpu.memory_space<vmem>>, vector<1x8x128xf32>
    %4 = vector.shape_cast %3 : vector<1x8x128xf32> to vector<8x128xf32>
    %c0_3 = arith.constant 0 : index
    %c0_4 = arith.constant 0 : index
    %5 = vector.load %arg7[%c0_3, %c0_4] : memref<8x256xf32, #tpu.memory_space<vmem>>, vector<8x128xf32>
    tpu.vector_store %arg7[%c0_3, %c0_4], %4 {strides = array<i32>} : memref<8x256xf32, #tpu.memory_space<vmem>>, vector<8x128xf32>,
    %c0_5 = arith.constant 0 : index
    %c0_6 = arith.constant 0 : index
    %c0_7 = arith.constant 0 : index
    %6 = vector.load %arg3[%c0_5, %c0_6, %c0_7] : memref<1x8x128xf32, #tpu.memory_space<vmem>>, vector<1x8x128xf32>
    %7 = vector.shape_cast %6 : vector<1x8x128xf32> to vector<8x128xf32>
    %c0_8 = arith.constant 0 : index
    %c128 = arith.constant 128 : index
    %8 = vector.load %arg7[%c0_8, %c128] : memref<8x256xf32, #tpu.memory_space<vmem>>, vector<8x128xf32>
    tpu.vector_store %arg7[%c0_8, %c128], %7 {strides = array<i32>} : memref<8x256xf32, #tpu.memory_space<vmem>>, vector<8x128xf32>,
    %c0_9 = arith.constant 0 : index
    %c0_10 = arith.constant 0 : index
    %9 = vector.load %arg5[%c0_9, %c0_10] : memref<8x1xf32, #tpu.memory_space<vmem>>, vector<8x1xf32>
    %c0_11 = arith.constant 0 : index
    %c0_12 = arith.constant 0 : index
    %c0_13 = arith.constant 0 : index
    %10 = vector.load %arg4[%c0_11, %c0_12, %c0_13] : memref<3x8x8xf32, #tpu.memory_space<vmem>>, vector<1x8x8xf32>
    %11 = vector.shape_cast %10 : vector<1x8x8xf32> to vector<8x8xf32>
    %c0_14 = arith.constant 0 : index
    %c0_15 = arith.constant 0 : index
    %12 = vector.load %arg7[%c0_14, %c0_15] : memref<8x256xf32, #tpu.memory_space<vmem>>, vector<8x128xf32>
    %cst = arith.constant dense<0.000000e+00> : vector<8x128xf32>
    %13 = tpu.matmul %11, %12, %cst {dimension_numbers = #tpu.dot_dimension_numbers<[1], [0], [0], [1], [0, 0, 1, 1], [], []>} : vector<8x8xf32>, vector<8x128xf32>, vector<8x128xf32> -> vector<8x128xf32>
    %c1 = arith.constant 1 : index
    %c0_16 = arith.constant 0 : index
    %c0_17 = arith.constant 0 : index
    %14 = vector.load %arg4[%c1, %c0_16, %c0_17] : memref<3x8x8xf32, #tpu.memory_space<vmem>>, vector<1x8x8xf32>
    %15 = vector.shape_cast %14 : vector<1x8x8xf32> to vector<8x8xf32>
    %c0_18 = arith.constant 0 : index
    %c2 = arith.constant 2 : index
    %16 = vector.load %arg7[%c0_18, %c2] : memref<8x256xf32, #tpu.memory_space<vmem>>, vector<8x128xf32>
    %cst_19 = arith.constant dense<0.000000e+00> : vector<8x128xf32>
    %17 = tpu.matmul %15, %16, %cst_19 {dimension_numbers = #tpu.dot_dimension_numbers<[1], [0], [0], [1], [0, 0, 1, 1], [], []>} : vector<8x8xf32>, vector<8x128xf32>, vector<8x128xf32> -> vector<8x128xf32>
    %18 = arith.addf %13, %17 : vector<8x128xf32>
    %c2_20 = arith.constant 2 : index
    %c0_21 = arith.constant 0 : index
    %c0_22 = arith.constant 0 : index
    %19 = vector.load %arg4[%c2_20, %c0_21, %c0_22] : memref<3x8x8xf32, #tpu.memory_space<vmem>>, vector<1x8x8xf32>
    %20 = vector.shape_cast %19 : vector<1x8x8xf32> to vector<8x8xf32>
    %c0_23 = arith.constant 0 : index
    %c4 = arith.constant 4 : index
    %21 = vector.load %arg7[%c0_23, %c4] : memref<8x256xf32, #tpu.memory_space<vmem>>, vector<8x128xf32>
    %cst_24 = arith.constant dense<0.000000e+00> : vector<8x128xf32>
    %22 = tpu.matmul %20, %21, %cst_24 {dimension_numbers = #tpu.dot_dimension_numbers<[1], [0], [0], [1], [0, 0, 1, 1], [], []>} : vector<8x8xf32>, vector<8x128xf32>, vector<8x128xf32> -> vector<8x128xf32>
    %23 = arith.addf %18, %22 : vector<8x128xf32>
    %24 = vector.broadcast %9 : vector<8x1xf32> to vector<8x128xf32>
    %25 = arith.addf %23, %24 : vector<8x128xf32>
    %cst_25 = arith.constant 0.000000e+00 : f32
    %26 = vector.broadcast %cst_25 : f32 to vector<8x128xf32>
    %27 = arith.maximumf %25, %26 : vector<8x128xf32>
    %c0_i32_26 = arith.constant 0 : i32
    %28 = arith.cmpi slt, %arg1, %c0_i32_26 : i32
    %29 = arith.extui %28 : i1 to i32
    %c0_i32_27 = arith.constant 0 : i32
    %30 = arith.cmpi ne, %29, %c0_i32_27 : i32
    scf.if %30 {
      %cst_30 = arith.constant dense<0.000000e+00> : vector<8xf32>
      %34 = vector.multi_reduction <add>, %27, %cst_30 [1] : vector<8x128xf32> to vector<8xf32>
      %35 = vector.shape_cast %34 : vector<8xf32> to vector<1x8xf32>
      %36 = arith.mulf %27, %27 : vector<8x128xf32>
      %cst_31 = arith.constant dense<0.000000e+00> : vector<8xf32>
      %37 = vector.multi_reduction <add>, %36, %cst_31 [1] : vector<8x128xf32> to vector<8xf32>
      %38 = vector.shape_cast %37 : vector<8xf32> to vector<1x8xf32>
      %c0_32 = arith.constant 0 : index
      %c0_33 = arith.constant 0 : index
      %c0_34 = arith.constant 0 : index
      %39 = vector.load %arg6[%c0_32, %c0_33, %c0_34] : memref<1x2x8xf32, #tpu.memory_space<vmem>>, vector<1x2x8xf32>
      %40 = tpu.concatenate %35, %38 in 0 : vector<1x8xf32>, vector<1x8xf32> -> vector<2x8xf32>
      %41 = vector.shape_cast %40 : vector<2x8xf32> to vector<1x2x8xf32>
      %42 = arith.addf %39, %41 : vector<1x2x8xf32>
      %c0_35 = arith.constant 0 : index
      %c0_36 = arith.constant 0 : index
      %c0_37 = arith.constant 0 : index
      %43 = vector.load %arg6[%c0_35, %c0_36, %c0_37] : memref<1x2x8xf32, #tpu.memory_space<vmem>>, vector<1x2x8xf32>
      tpu.vector_store %arg6[%c0_35, %c0_36, %c0_37], %42 {strides = array<i32>} : memref<1x2x8xf32, #tpu.memory_space<vmem>>, vector<1x2x8xf32>,
    } else {
    }
    %c0_i32_28 = arith.constant 0 : i32
    %31 = arith.cmpi eq, %arg1, %c0_i32_28 : i32
    %32 = arith.extui %31 : i1 to i32
    %c0_i32_29 = arith.constant 0 : i32
    %33 = arith.cmpi ne, %32, %c0_i32_29 : i32
    scf.if %33 {
      %c128_i32 = arith.constant 128 : i32
      %34 = arith.muli %arg1, %c128_i32 : i32
      %35 = tpu.iota {dimensions = array<i32: 1>} : vector<8x128xi32>
      %36 = vector.broadcast %34 : i32 to vector<8x128xi32>
      %37 = arith.addi %36, %35 : vector<8x128xi32>
      %c16_i32 = arith.constant 16 : i32
      %38 = vector.broadcast %c16_i32 : i32 to vector<8x128xi32>
      %39 = arith.cmpi slt, %37, %38 : vector<8x128xi32>
      %cst_30 = arith.constant 0.000000e+00 : f32
      %40 = vector.broadcast %cst_30 : f32 to vector<8x128xf32>
      %41 = arith.select %39, %27, %40 : vector<8x128xi1>, vector<8x128xf32>
      %cst_31 = arith.constant dense<0.000000e+00> : vector<8xf32>
      %42 = vector.multi_reduction <add>, %41, %cst_31 [1] : vector<8x128xf32> to vector<8xf32>
      %43 = vector.shape_cast %42 : vector<8xf32> to vector<1x8xf32>
      %44 = arith.mulf %41, %41 : vector<8x128xf32>
      %cst_32 = arith.constant dense<0.000000e+00> : vector<8xf32>
      %45 = vector.multi_reduction <add>, %44, %cst_32 [1] : vector<8x128xf32> to vector<8xf32>
      %46 = vector.shape_cast %45 : vector<8xf32> to vector<1x8xf32>
      %c0_33 = arith.constant 0 : index
      %c0_34 = arith.constant 0 : index
      %c0_35 = arith.constant 0 : index
      %47 = vector.load %arg6[%c0_33, %c0_34, %c0_35] : memref<1x2x8xf32, #tpu.memory_space<vmem>>, vector<1x2x8xf32>
      %48 = tpu.concatenate %43, %46 in 0 : vector<1x8xf32>, vector<1x8xf32> -> vector<2x8xf32>
      %49 = vector.shape_cast %48 : vector<2x8xf32> to vector<1x2x8xf32>
      %50 = arith.addf %47, %49 : vector<1x2x8xf32>
      %c0_36 = arith.constant 0 : index
      %c0_37 = arith.constant 0 : index
      %c0_38 = arith.constant 0 : index
      %51 = vector.load %arg6[%c0_36, %c0_37, %c0_38] : memref<1x2x8xf32, #tpu.memory_space<vmem>>, vector<1x2x8xf32>
      tpu.vector_store %arg6[%c0_36, %c0_37, %c0_38], %50 {strides = array<i32>} : memref<1x2x8xf32, #tpu.memory_space<vmem>>, vector<1x2x8xf32>,
    } else {
    }
    return
  }
  func.func @transform_0(%arg0: i32, %arg1: i32) -> (i32, i32, i32) {
    %c0_i32 = arith.constant 0 : i32
    %c0_i32_0 = arith.constant 0 : i32
    return %arg0, %c0_i32, %arg1 : i32, i32, i32
  }
  func.func @transform_1(%arg0: i32, %arg1: i32) -> (i32, i32, i32) {
    %c1_i32 = arith.constant 1 : i32
    %0 = arith.addi %arg1, %c1_i32 : i32
    %c1_i32_0 = arith.constant 1 : i32
    %1 = arith.muli %0, %c1_i32_0 : i32
    %c0_i32 = arith.constant 0 : i32
    %c0_i32_1 = arith.constant 0 : i32
    return %arg0, %c0_i32, %1 : i32, i32, i32
  }
  func.func @transform_2(%arg0: i32, %arg1: i32) -> (i32, i32, i32) {
    %c0_i32 = arith.constant 0 : i32
    %c0_i32_0 = arith.constant 0 : i32
    %c0_i32_1 = arith.constant 0 : i32
    %c0_i32_2 = arith.constant 0 : i32
    return %c0_i32, %c0_i32_0, %c0_i32_1 : i32, i32, i32
  }
  func.func @transform_3(%arg0: i32, %arg1: i32) -> (i32, i32) {
    %c0_i32 = arith.constant 0 : i32
    %c0_i32_0 = arith.constant 0 : i32
    %c0_i32_1 = arith.constant 0 : i32
    return %c0_i32, %c0_i32_0 : i32, i32
  }
  func.func @transform_4(%arg0: i32, %arg1: i32) -> (i32, i32, i32) {
    %c0_i32 = arith.constant 0 : i32
    %c0_i32_0 = arith.constant 0 : i32
    %c0_i32_1 = arith.constant 0 : i32
    return %arg0, %c0_i32, %c0_i32_0 : i32, i32, i32
  }
}

</mosaic_0001>

<bundles_post_ra>
// kernel: tpu_custom_call.1
= control target key start
LH: loop header
LB: loop body
LE: loop exit
PB: predicated region body
PF: predicated region fallthrough
CT: control target
= control target key end

     0   :  { %s1276_s0 = inlined_call_operand.hbm [shape: f32[2,8,256], index: 0, kind: input, shape index: {}]   ;;  %s1277_s1 = inlined_call_operand.hbm [shape: f32[2,8,256], index: 1, kind: input, shape index: {}]   ;;  %s1278_s2 = inlined_call_operand.hbm [shape: f32[3,8,8], index: 2, kind: input, shape index: {}]   ;;  %s1279_s3 = inlined_call_operand.vmem [shape: f32[8,1], index: 3, kind: input, shape index: {}]   ;;  %s1280_s4 = inlined_call_operand.hbm [shape: f32[2,2,8], index: 4, kind: output, shape index: {}]  }
   0x1   :  { %1282 = sst [smem:[#allocation15_spill]] %s1276_s0 }
   0x2   :  { %1283 = sst [smem:[#allocation16_spill]] %s1278_s2 }
   0x3   :  { %9 = vsyncpa [#allocation4], 0 }
   0x4   :  { %11 = vsyncpa [#allocation4 + $0x1], 0 }
   0x5   :  { %12 = vsyncpa [#allocation7], 0 }
   0x6   :  { %14 = vsyncpa [#allocation7 + $0x1], 0 }
   0x7   :  { %15 = vsyncpa [#allocation5], 0 }
   0x8   :  { %17 = vsyncpa [#allocation5 + $0x1], 0  ;;  %s1083_s15 = smov 0   ;;  %s1085_s16 = smov 0  }
   0x9   :  { %s1087_s17 = smov 0   ;;  %s1089_s18 = smov 0  }
   0xa   :  { %s1091_s19 = smov 0   ;;  %s1093_s20 = smov 0  }
   0xb LB: > { %s1114_s21 = sadd.s32 4294967295, %s1045_s20   ;;  %s743_s22 = sadd.s32 4294967294, %s1045_s20   ;;  %s1045_s20 = sphi %s1093_s20, %s23_s20   ;;  %s1041_s19 = sphi %s1091_s19, %s1302_s19   ;;  %s1037_s18 = sphi %s1089_s18, %s1301_s18   ;;  %s1033_s17 = sphi %s1087_s17, %s1300_s17   ;;  %s1029_s16 = sphi %s1085_s16, %s1299_s16   ;;  %s1025_s15 = sphi %s1083_s15, %s1298_s15  }
   0xc   : > { %p57_p0 = scmp.ne.s32.totalorder %s1029_s16, %s1025_s15  ;;  %p58_p1 = scmp.eq.s32.totalorder %s1114_s21, 0 }
   0xd   : > { %p159_p3 = scmp.eq.s32.totalorder %s743_s22, 1  ;;  %p744_p5 = scmp.ge.s32.totalorder %s1045_s20, 1 }
   0xe   : > { %p1123_p4 = por %p58_p1, %p57_p0  ;;  %p166_p7 = scmp.lt.s32.totalorder %s1045_s20, 3 }
   0xf   : > { %p1128_p6 = por %p159_p3, %p57_p0  ;;  %s1047_s26 = smov [#allocation8]  }
  0x10   : > { %p1133_p8 = pnand %p744_p5, %p166_p7  ;;  %s178_s27 = sshll.u32 %s1047_s26, 4  ;;  %s179_s27 = int_to_ptr.vmem [resolvable:$true] %s178_s27 }
  0x11   : > { %s1285_s24 = scalar_select %p1128_p6, 1, 0 }
  0x12   : > { %p798_p9 = pneg %p1133_p8  ;;  %s35_s29 = sadd.s32 1, %s1041_s19 }
  0x13   : > { %s885_s30 = scalar_lea.vmem %s179_s27, 384  ;;  %p893_p5 = scmp.lt.s32.totalorder %s179_s27, %s179_s27 }
  0x14   : > { %p1142_p11 = pnand %p798_p9, %p58_p1  ;;  %p886_p13 = scmp.ne.s32.totalorder %s179_s27, %s885_s30 }
  0x15   : > { %p894_p7 = scmp.lt.s32.totalorder %s885_s30, %s885_s30 }
  0x16   : > { %p876_p12 = pneg %p1142_p11 }
  0x17   : > { %p895_p2 = por %p894_p7, %p893_p5 }
  0x18   : > { %p888_p0 = pnand %p886_p13, %p876_p12 }
  0x1a   : > { %p889_p3 = pneg %p888_p0 }
  0x1c   : > { %p896_p6 = pnand %p895_p2, %p889_p3 }
  0x1e   : > { %899 = shalt.err (!%p896_p6)
}
  0x1f   : > { %s1048_s5 = smov 128   ;;  %s1049_s6 = smov 8  }
  0x20   : > { %s1288_s2 = sld [smem:[#allocation16_spill]]  ;;  %p37_p2 = scmp.ge.s32.totalorder %s35_s29, 2 }
  0x21   : > { %s44_s9 = sadd.s32 1, %s1033_s17  ;;  %p51_p6 = scmp.ne.s32.totalorder %s1033_s17, %s1029_s16 }
  0x22   : > { %p52_p9 = scmp.eq.s32.totalorder %s1045_s20, 0  ;;  %s1304_s29 = smov (%p37_p2, %s35_s29), 0 }
  0x23   : > { %1289 = sst [smem:[#allocation14_spill]] %s1304_s29  ;;  %p1291_p13 = scmp.eq.s32.totalorder %s1114_s21, 1 }
  0x24   : > { %p1160_p12 = por %p52_p9, %p51_p6  ;;  %s39_s12 = ssub.s32 %s1041_s19, %s1304_s29 }
  0x25   : > { %p1166_p0 = por %p1291_p13, %p51_p6  ;;  %p42_p3 = scmp.eq.s32.totalorder %s39_s12, 0 }
  0x26   : > { %801 = dma.hbm_to_vmem [thread:$0]  (!%p1142_p11), %s1288_s2, 384, %s179_s27, [#allocation7], %s1048_s5, %s1048_s5, %s1049_s6  }
  0x27   : > { %p814_p11 = scmp.lt.s32.totalorder %s1045_s20, 2  ;;  %s195_s13 = sand.u32 1, %s1033_s17  }
  0x28   : > { %s747_s14 = sshll.u32 %s195_s13, 3  ;;  %s765_s26 = sshll.u32 %s1041_s19, 8 }
  0x29   : > { %s1175_s22 = scalar_select %p42_p3, %s1033_s17, %s44_s9  }
  0x2a   : > { %s1293_s0 = sld [smem:[#allocation15_spill]]  ;;  %s199_s5 = scalar_lea.vmem [#allocation3], %s747_s14 }
  0x2b   : > { %s208_s6 = sshll.u32 %s199_s5, 4  ;;  %p1183_p5 = pnand %p814_p11, %p1160_p12  ;;  %s209_s6 = int_to_ptr.vmem [resolvable:$true] %s208_s6 }
  0x2c   : > { %s1190_s9 = scalar_lea.hbm %s1277_s1, %s765_s26  ;;  %s215_s12 = sand.u32 1, %s1045_s20  }
  0x2d   : > { %s196_s29 = scalar_lea.sflag [#allocation4], %s195_s13  ;;  %p902_p7 = pneg %p1183_p5 }
  0x2e   : > { %s913_s27 = scalar_lea.vmem %s209_s6, 128  ;;  %s1050_s10 = smov [#allocation3]  }
  0x2f   : > { %p914_p2 = scmp.ne.s32.totalorder %s209_s6, %s913_s27  ;;  %s918_s28 = sshll.u32 %s1050_s10, 4  ;;  %s919_s28 = int_to_ptr.vmem [resolvable:$false] %s918_s28 }
  0x30   : > { %s206_s30 = scalar_lea.hbm %s1293_s0, %s765_s26  ;;  %s920_s5 = scalar_lea.vmem %s919_s28, 256 }
  0x31   : > { %p916_p6 = pnand %p914_p2, %p902_p7  ;;  %p921_p12 = scmp.lt.s32.totalorder %s209_s6, %s919_s28 }
  0x32   : > { %p922_p13 = scmp.lt.s32.totalorder %s920_s5, %s913_s27 }
  0x33   : > { %p917_p9 = pneg %p916_p6 }
  0x34   : > { %p923_p11 = por %p922_p13, %p921_p12 }
  0x36   : > { %p924_p3 = pnand %p923_p11, %p917_p9 }
  0x38   : > { %927 = shalt.err (!%p924_p3)
}
  0x39   : > { %805 = dma.hbm_to_vmem [thread:$0]  (!%p1183_p5), %s206_s30, 128, %s209_s6, %s196_s29  }
  0x3a   : > { %s668_s2 = scalar_lea.hbm %s1190_s9, 128  ;;  %s219_s13 = scalar_lea.vmem [#allocation6], %s747_s14 }
  0x3b   : > { %s229_s26 = sshll.u32 %s219_s13, 4  ;;  %s216_s8 = scalar_lea.sflag [#allocation7], %s215_s12  ;;  %s230_s26 = int_to_ptr.vmem [resolvable:$true] %s229_s26 }
  0x3c   : > { %s941_s0 = scalar_lea.vmem %s230_s26, 128  ;;  %s1051_s27 = smov [#allocation6]  }
  0x3d   : > { %p942_p2 = scmp.ne.s32.totalorder %s230_s26, %s941_s0  ;;  %s946_s10 = sshll.u32 %s1051_s27, 4  ;;  %s947_s10 = int_to_ptr.vmem [resolvable:$false] %s946_s10 }
  0x3e   : > { %s948_s28 = scalar_lea.vmem %s947_s10, 256  ;;  %p949_p9 = scmp.lt.s32.totalorder %s230_s26, %s947_s10 }
  0x3f   : > { %p944_p6 = pnand %p942_p2, %p902_p7  ;;  %p950_p12 = scmp.lt.s32.totalorder %s948_s28, %s941_s0 }
  0x41   : > { %p945_p10 = pneg %p944_p6  ;;  %p951_p13 = por %p950_p12, %p949_p9 }
  0x43   : > { %p952_p11 = pnand %p951_p13, %p945_p10 }
  0x45   : > { %955 = shalt.err (!%p952_p11)
}
  0x46   : > { %808 = dma.hbm_to_vmem [thread:$0]  (!%p1183_p5), %s668_s2, 128, %s230_s26, %s216_s8  }
  0x47   : > { %238 = sbr.rel (%p1133_p8) target bundleno = 569 (0x239), region = 36  ;;  %s1209_s29 = sand.u32 (!%p1133_p8), 1, %s1029_s16  }
  0x48   : > { %s754_s14 = sshll.u32 (!%p1133_p8), %s1209_s29, 3  ;;  %s241_s30 = scalar_lea.sflag (!%p1133_p8), [#allocation4], %s1209_s29 }
  0x49   : > { %s244_s6 = scalar_lea.vmem (!%p1133_p8), [#allocation3], %s754_s14 }
  0x4c   : > { %1008 = dma.done.wait (%p1123_p4), %s241_s30, 128  }
  0x4d   : > { %1010 = vsyncadd (%p1123_p4), %s241_s30, 4294967168  ;;  %s249_s0 = sand.u32 1, %s1114_s21   ;;  %s253_s25 = scalar_lea.vmem [#allocation6], %s754_s14 }
  0x4e   : > { %s250_s7 = scalar_lea.sflag [#allocation7], %s249_s0 }
  0x4f   : > { %1012 = dma.done.wait (%p1123_p4), %s250_s7, 128  }
  0x50   : > { %1014 = vsyncadd (%p1123_p4), %s250_s7, 4294967168 }
  0x51   : > { %1016 = dma.done.wait (%p58_p1), [#allocation7], 384  }
  0x52   : > { %1018 = vsyncadd (%p58_p1), [#allocation7], 4294966912  ;;  %v1052_v0 = vmov 0.0   ;;  %vm1053_vm0 = vmmov 0   ;;  %v1054_v1 = vmov 0   ;;  %v294_v2 = vld [vmem:[%s244_s6] sm:$0xff]  ;;  %v584_v15 = vlaneseq }
  0x53   : > { %773 = vmatprep.subr.mxu0 %v1052_v0  ;;  %778 = vmatprep.subr.mxu1 %v1052_v0  ;;  %vm314_vm1 = vcmask 64512   ;;  %s1055_s23 = smov 124   ;;  %s1056_s9 = smov 126   ;;  %v299_v3 = vld [vmem:[#allocation8] sm:$0xff]  ;;  %v296_v4 = vld [vmem:[%s253_s25] sm:$0xff]  ;;  %vm311_vm2 = vcmask 1031168  }
  0x54   : > { %775 = vmatprep.mubr.msk.f32.mxu0 %vm1053_vm0, %v1052_v0  ;;  %780 = vmatprep.mubr.msk.f32.mxu1 %vm1053_vm0, %v1052_v0  ;;  %v298_v5 = vld [vmem:[%s1279_s3] sm:$0xff]  ;;  %vm467_vm3 = vcmask 1014784   ;;  %v302_v10 = vld [vmem:[#allocation8 + $0x8] sm:$0xff]  ;;  %v462_v13 = vld [vmem:[#allocation8 + $0x10] sm:$0xff]  ;;  %v585_v17 = vand.u32 127, %v584_v15  ;;  %v598_v18 = vshrl.u32 %v584_v15, 7 }
  0x55   : > { %873 = vset.pattern.permute.xlu0 %v1054_v1  ;;  %463 = vrot.lane.b32.xlu1 %v294_v2, %s1055_s23  ;;  %s757_s5 = sshll.u32 %s1209_s29, 1  ;;  %vm292_vm5 = vcmask 58368   ;;  %vm608_vm6 = vcmask 1040384   ;;  %s762_s13 = sshll.u32 %s1037_s18, 5 }
  0x56   : > { %307 = vrot.lane.b32.xlu0 %v294_v2, %s1056_s9  ;;  %779 = vmatpush3.msra.mxu1 %v294_v2  ;;  %v599_v19 = vsub.s32 %v585_v17, %v598_v18  ;;  %vm588_vm4 = vcmp.lt.s32.totalorder %v585_v17, 16  ;;  %s286_s2 = scalar_lea.vmem [#allocation9], %s757_s5  ;;  %s625_s10 = scalar_lea.hbm %s1280_s4, %s762_s13 }
  0x57   : > { %781 = vmatmul.mubr.msk.f32.vlgmr.msra.gmra.mxu1 %vm314_vm1, %v299_v3  ;;  %293 = vst.msk [vmem:[%s286_s2] sm:$0x3] %vm292_vm5, %v1052_v0  ;;  %s627_s26 = sshll.u32 %s286_s2, 4  ;;  %s614_s28 = scalar_lea.sflag [#allocation5], %s1209_s29  ;;  %s628_s26 = int_to_ptr.vmem [resolvable:$true] %s627_s26 }
  0x58   : > { %s957_s14 = scalar_lea.vmem %s628_s26, 32  ;;  %s1057_s30 = smov [#allocation9]  }
  0x59   : > { %465 = vrot.lane.b32.xlu1 %v296_v4, %s1055_s23  ;;  %p958_p1 = scmp.ne.s32.totalorder %s628_s26, %s957_s14  ;;  %s961_s6 = sshll.u32 %s1057_s30, 4  ;;  %s962_s6 = int_to_ptr.vmem [resolvable:$false] %s961_s6 }
  0x5a   : > { %309 = vrot.lane.b32.xlu0 %v296_v4, %s1056_s9  ;;  %s963_s0 = scalar_lea.vmem %s962_s6, 64  ;;  %p964_p10 = scmp.lt.s32.totalorder %s628_s26, %s962_s6 }
  0x5b   : > { %p959_p4 = pnand %p958_p1, %p1166_p0  ;;  %p965_p5 = scmp.lt.s32.totalorder %s963_s0, %s957_s14 }
  0x5d   : > { %p960_p8 = pneg %p959_p4  ;;  %p966_p7 = por %p965_p5, %p964_p10 }
  0x5e   : > { %546 = vperm.xlu0 %873, %v298_v5   ;;  %v595_v34 = vld [vmem:[%s286_s2] sm:$0x3] }
  0x5f   : > { %p967_p3 = pnand %p966_p7, %p960_p8 }
  0xc7   : > { %v464_v6 = vpop.permute.xlu1 %463 }
  0xc8   : > { %v308_v7 = vpop.permute.xlu0 %307 }
  0xcb   : > { %v466_v8 = vpop.permute.xlu1 %465 }
  0xcc   : > { %v310_v9 = vpop.permute.xlu0 %309  ;;  %v468_v12 = vsel %vm467_vm3, %v464_v6, %v466_v8 }
  0xcd   : > { %v312_v11 = vsel %vm311_vm2, %v308_v7, %v310_v9 }
  0xce   : > { %774 = vmatpush3.msra.mxu0 %v312_v11 }
  0xcf   : > { %776 = vmatmul.mubr.msk.f32.vlgmr.msra.gmra.mxu0 %vm314_vm1, %v302_v10  ;;  %783 = vmatprep.subr.mxu0 %v1052_v0 }
  0xd0   : > { %784 = vmatpush3.msra.mxu0 %v468_v12  ;;  %785 = vmatprep.mubr.msk.f32.mxu0 %vm1053_vm0, %v1052_v0 }
  0xd3   : > { %786 = vmatmul.mubr.msk.f32.vlgmr.msra.gmra.mxu0 %vm314_vm1, %v462_v13 }
  0xd9   : > { %v547_v24 = vpop.permute.xlu0 %546 }
 0x117   : > { %v457_v14 = vpop.f32.mrf.mxu1 }
 0x119   : > { %v782_v16 = vpop.f32.mrf.mxu1 }
 0x18f   : > { %v384_v20 = vpop.f32.mrf.mxu0 }
 0x190   : > { %v458_v22 = vadd.f32 %v457_v14, %v384_v20 }
 0x191   : > { %v777_v21 = vpop.f32.mrf.mxu0 }
 0x193   : > { %v539_v23 = vpop.f32.mrf.mxu0 }
 0x194   : > { %v543_v25 = vadd.f32 %v539_v23, %v458_v22 }
 0x195   : > { %v787_v26 = vpop.f32.mrf.mxu0 }
 0x196   : > { %v549_v27 = vadd.f32 %v547_v24, %v543_v25 }
 0x198   : > { %v550_v28 = vmax.f32 %v549_v27, 0.0 }
 0x19a   : > { %v589_v29 = vsel %vm588_vm4, %v550_v28, 0.0 }
 0x19b   : > { %590 = vadd.xlane.f32.xlu1 %v589_v29  ;;  %v592_v30 = vmul.f32 %v589_v29, %v589_v29 }
 0x19d   : > { %593 = vadd.xlane.f32.xlu0 %v592_v30 }
 0x224   : > { %v591_v31 = vpop.xlane.xlu1 %590 }
 0x225   : > { %v600_v33 = vrot.slane %v591_v31, %v599_v19 }
 0x226   : > { %v594_v32 = vpop.xlane.xlu0 %593 }
 0x227   : > { %v606_v35 = vrot.slane %v594_v32, %v599_v19 }
 0x229   : > { %v609_v36 = vsel %vm608_vm6, %v600_v33, %v606_v35 }
 0x22a   : > { %v610_v37 = vadd.f32 %v609_v36, %v595_v34 }
 0x22c   : > { %612 = vst.msk [vmem:[%s286_s2] sm:$0x3] %vm292_vm5, %v610_v37 }
 0x22d   : > { %970 = shalt.err (!%p967_p3)
}
 0x22e   : > { %s971_s18 = scalar_lea.hbm %s625_s10, 32  ;;  %s975_s25 = scalar_lea.hbm %s1280_s4, 64 }
 0x22f   : > { %p972_p2 = scmp.ne.s32.totalorder %s625_s10, %s971_s18  ;;  %p976_p12 = scmp.lt.s32.totalorder %s625_s10, %s1280_s4 }
 0x230   : > { %p977_p13 = scmp.lt.s32.totalorder %s975_s25, %s971_s18 }
 0x231   : > { %p973_p6 = pnand %p972_p2, %p1166_p0 }
 0x232   : > { %p978_p11 = por %p977_p13, %p976_p12 }
 0x233   : > { %p974_p9 = pneg %p973_p6 }
 0x235   : > { %p979_p1 = pnand %p978_p11, %p974_p9 }
 0x237   : > { %982 = shalt.err (!%p979_p1)
}
 0x238   : > { %796 = dma.vmem_to_hbm [thread:$0]  (%p1166_p0), %s628_s26, 32, %s625_s10, %s614_s28  }
 0x239 PF: > { %s639_s21 = sand.u32 1, %s1025_s15   ;;  %p1295_p4 = scmp.ne.s32.totalorder %s1285_s24, 0 }
 0x23a   : > { %p1296_p8 = scmp.ge.s32.totalorder %s1045_s20, 2  ;;  %s640_s12 = scalar_lea.sflag [#allocation5], %s639_s21 }
 0x23c   : > { %p810_p10 = pnand %p1296_p8, %p1295_p4 }
 0x23e   : > { %p811_p5 = pneg %p810_p10 }
 0x240   : > { %1020 = dma.done.wait (%p811_p5), %s640_s12, 32  }
 0x241   : > { %1022 = vsyncadd (%p811_p5), %s640_s12, 4294967264  ;;  %s23_s20 = sadd.s32 1, %s1045_s20   ;;  %s1297_s11 = sld [smem:[#allocation14_spill]] }
 0x242   : > { %p20_p7 = scmp.ge.s32.totalorder %s23_s20, 4   ;;  %s1298_s15 = smov %s1029_s16 }
 0x243   : > { %s1299_s16 = smov %s1033_s17  ;;  %s1300_s17 = smov %s1175_s22 }
 0x244   : > { %s1301_s18 = smov %s1041_s19  ;;  %22 = sbr.rel (!%p20_p7) target bundleno = 11 (0xb), region = 112 }
 0x247   : > { %s1302_s19 = smov %s1297_s11 }
 0x249   :  { %645 = vsyncpa [#allocation4], 1 }
 0x24a   :  { %647 = vsyncpa [#allocation4 + $0x1], 1 }
 0x24b   :  { %648 = vsyncpa [#allocation7], 1 }
 0x24c   :  { %650 = vsyncpa [#allocation7 + $0x1], 1 }
 0x24d   :  { %651 = vsyncpa [#allocation5], 1 }
 0x24e   :  { %653 = vsyncpa [#allocation5 + $0x1], 1 }

</bundles_post_ra>
